<compile_context>
chip_gen: v6e
topology: v6e:2x2x1
jax: 0.10.0
libtpu: 0.0.40
codegen_flags: <defaults>
</compile_context>

<pallas_src>
import functools

import jax
import jax.numpy as jnp
from jax import lax
from jax.experimental import pallas as pl
from jax.experimental.pallas import tpu as pltpu

LN_EPS = 1e-5  # nn.LayerNorm default


def _round_up(x, m):
    return (x + m - 1) // m * m


@functools.lru_cache(maxsize=None)
def _vmem_limit_bytes():
    """Generation-aware scoped-VMEM limit (v5e/v6e: 128 MiB physical -> 96 MiB budget;
    v7x: 64 MiB physical -> 48 MiB budget), passed to every pallas_call."""
    cap = 64 * 1024 * 1024
    try:
        cap = int(getattr(pltpu.get_tpu_info(), "vmem_capacity_bytes", cap))
    except Exception:
        pass
    return min(cap * 3 // 4, 100 * 1024 * 1024)


@functools.lru_cache(maxsize=None)
def _single_buffer_supported():
    """Probe whether BlockSpec(pipeline_mode=pl.Buffered(1)) lowers on this jax/Mosaic.

    Grid-invariant (resident) operands never change block index, so double-buffering
    them is pure VMEM waste; single-buffering halves their footprint (matters most on
    v7x's 64 MiB VMEM).  The probe is compile-only and cached."""
    try:
        spec = pl.BlockSpec((8, 128), lambda i: (0, 0), pipeline_mode=pl.Buffered(1))

        def _probe(x_ref, o_ref):
            o_ref[...] = x_ref[...] + 1.0

        fn = pl.pallas_call(
            _probe,
            out_shape=jax.ShapeDtypeStruct((8, 128), jnp.float32),
            grid=(1,),
            in_specs=[spec],
            out_specs=pl.BlockSpec((8, 128), lambda i: (0, 0)),
        )
        jax.jit(fn).lower(jax.ShapeDtypeStruct((8, 128), jnp.float32)).compile()
        return True
    except Exception:
        return False


def _grid_invariant_spec(shape, grid_rank):
    """BlockSpec for a whole-array operand whose block index never changes."""
    zeros = (0,) * len(shape)
    if grid_rank == 1:
        index_map = lambda i: zeros
    elif grid_rank == 2:
        index_map = lambda i, k: zeros
    else:
        index_map = lambda i, j, k: zeros
    if _single_buffer_supported():
        return pl.BlockSpec(shape, index_map, pipeline_mode=pl.Buffered(1))
    return pl.BlockSpec(shape, index_map)


def _choose_tm(batch, sublane):
    """Batch (sublane) tile: <=256 rows, rounded to the dtype-native sublane, and sized
    so batches large enough to split give >=2 tiles on the 'parallel' grid axis (both
    v7x TensorCores busy, DMA overlapped)."""
    m = _round_up(max(int(batch), 1), sublane)
    half = _round_up(-(-m // 2), sublane)
    return max(sublane, min(256, half))


def _resident_bytes(params, norms):
    total = 0
    for layer in params:
        total += layer["w"].size * layer["w"].dtype.itemsize
        total += layer["b"].size * layer["b"].dtype.itemsize
    for norm in norms:
        total += norm["gamma"].size * norm["gamma"].dtype.itemsize
        total += norm["beta"].size * norm["beta"].dtype.itemsize
    return total


def _pick_chunk(total, max_chunk):
    """Largest chunk <= max_chunk dividing `total` exactly (128-aligned when chunking),
    so weights never need per-call K padding.  Returns None if only padding would work."""
    if total <= max_chunk:
        return int(total)
    c = (max_chunk // 128) * 128
    while c >= 128:
        if total % c == 0:
            return int(c)
        c -= 128
    return None


def _ln_relu_f32(y, gamma, beta):
    """LayerNorm (two-pass mean/var: robust with bf16 matmuls) + affine + ReLU in f32;
    rsqrt runs on the EUP (free bundle slot)."""
    inv_n = 1.0 / y.shape[-1]
    mean = jnp.sum(y, axis=-1, keepdims=True) * inv_n
    d = y - mean
    var = jnp.sum(d * d, axis=-1, keepdims=True) * inv_n
    yn = d * lax.rsqrt(var + LN_EPS)
    return jnp.maximum(yn * gamma + beta, 0.0)


# --------------------------------------------------------------------------------------
# Path 1: fully fused MLP — one pallas_call, batch-tiled grid, activations stay in VMEM.
# --------------------------------------------------------------------------------------
def _fused_mlp_kernel(*refs, num_hidden):
    # refs = (x, [w, b, gamma, beta] * num_hidden, w_last, b_last, out)
    x_ref, out_ref = refs[0], refs[-1]
    h = x_ref[...].astype(refs[1].dtype)  # matmul dtype (bf16) from the first dot onward
    idx = 1
    for _ in range(num_hidden):
        w_ref, b_ref, g_ref, beta_ref = refs[idx:idx + 4]
        idx += 4
        y = jnp.dot(h, w_ref[...], preferred_element_type=jnp.float32)
        y = y + b_ref[...].astype(jnp.float32)
        # Carry the activation in the matmul dtype (halves vreg/spill pressure on v5e).
        h = _ln_relu_f32(y, g_ref[...].astype(jnp.float32),
                         beta_ref[...].astype(jnp.float32)).astype(w_ref.dtype)
    w_ref, b_ref = refs[idx], refs[idx + 1]
    y = jnp.dot(h, w_ref[...], preferred_element_type=jnp.float32)
    out_ref[...] = (y + b_ref[...].astype(jnp.float32)).astype(out_ref.dtype)


def mlp_forward_fused(x, params, norms, *, tm, vmem_limit):
    batch, in_dim = x.shape
    out_dim = params[-1]["w"].shape[1]
    num_hidden = len(params) - 1
    n_out = _round_up(out_dim, 128)           # lane-dense output stores (no vst.msk)

    m_pad = _round_up(max(batch, 1), tm)
    if m_pad != batch:
        x = jnp.pad(x, ((0, m_pad - batch), (0, 0)))

    w_last, b_last = params[-1]["w"], params[-1]["b"]
    if n_out != out_dim:                      # tiny pad, only the final projection
        w_last = jnp.pad(w_last, ((0, 0), (0, n_out - out_dim)))
        b_last = jnp.pad(b_last, ((0, 0), (0, n_out - out_dim)))

    operands = [x]
    in_specs = [pl.BlockSpec((tm, in_dim), lambda i: (i, 0))]
    for layer, norm in zip(params[:-1], norms):
        for a in (layer["w"], layer["b"], norm["gamma"], norm["beta"]):
            operands.append(a)
            in_specs.append(_grid_invariant_spec(a.shape, 1))
    for a in (w_last, b_last):
        operands.append(a)
        in_specs.append(_grid_invariant_spec(a.shape, 1))

    flops, prev = 0, in_dim
    for layer in params:
        n = layer["w"].shape[1]
        flops += 2 * m_pad * prev * n
        prev = n
    bytes_accessed = (x.size * x.dtype.itemsize + m_pad * n_out * x.dtype.itemsize
                      + _resident_bytes(params, norms))

    out = pl.pallas_call(
        functools.partial(_fused_mlp_kernel, num_hidden=num_hidden),
        out_shape=jax.ShapeDtypeStruct((m_pad, n_out), x.dtype),
        grid=(m_pad // tm,),
        in_specs=in_specs,
        out_specs=pl.BlockSpec((tm, n_out), lambda i: (i, 0)),
        compiler_params=pltpu.CompilerParams(
            dimension_semantics=("parallel",),
            vmem_limit_bytes=int(vmem_limit)),
        cost_estimate=pl.CostEstimate(
            flops=int(flops),
            transcendentals=int(m_pad * num_hidden),
            bytes_accessed=int(bytes_accessed)),
    )(*operands)
    return out[:batch, :out_dim]


# --------------------------------------------------------------------------------------
# Path 2: per-layer tiled kernels with an fp32 accumulator (large-model fallback).
# --------------------------------------------------------------------------------------
def _linear_ln_relu_kernel(x_ref, w_ref, b_ref, g_ref, beta_ref, o_ref, acc_ref):
    @pl.when(pl.program_id(1) == 0)
    def _():
        acc_ref[...] = jnp.zeros_like(acc_ref)

    acc_ref[...] += jnp.dot(x_ref[...].astype(w_ref.dtype), w_ref[...],
                            preferred_element_type=jnp.float32)

    @pl.when(pl.program_id(1) == pl.num_programs(1) - 1)
    def _():
        y = acc_ref[...] + b_ref[...].astype(jnp.float32)
        o_ref[...] = _ln_relu_f32(
            y, g_ref[...].astype(jnp.float32),
            beta_ref[...].astype(jnp.float32)).astype(o_ref.dtype)


def _linear_kernel(x_ref, w_ref, b_ref, o_ref, acc_ref):
    @pl.when(pl.program_id(2) == 0)
    def _():
        acc_ref[...] = jnp.zeros_like(acc_ref)

    acc_ref[...] += jnp.dot(x_ref[...].astype(w_ref.dtype), w_ref[...],
                            preferred_element_type=jnp.float32)

    @pl.when(pl.program_id(2) == pl.num_programs(2) - 1)
    def _():
        o_ref[...] = (acc_ref[...] + b_ref[...].astype(jnp.float32)).astype(o_ref.dtype)


def _ln_max_tk(n, tm, x_it, w_it, out_it, vmem_limit):
    reserved = tm * n * 4 + 2 * tm * n * out_it + 4 * 1024 * 1024  # acc + out tiles + headroom
    avail = max(vmem_limit - reserved, 1)
    per_tk = 2 * (tm * x_it + n * w_it)     # double-buffered x tile + W tile per K element
    return int(min(max(avail // per_tk, 128), 1024))


def _ln_layer_tiled(x_pad, w, b, gamma, beta, *, tm, vmem_limit, out_dtype):
    """Linear + LayerNorm + ReLU, grid=(M_tiles, K_tiles).  N stays whole (LayerNorm
    needs the full row); tk shrinks as N grows so the working set stays under the
    per-generation VMEM budget."""
    m_pad, k = x_pad.shape
    n = w.shape[1]
    out_it = jnp.dtype(out_dtype).itemsize
    max_tk = _ln_max_tk(n, tm, x_pad.dtype.itemsize, w.dtype.itemsize, out_it, vmem_limit)
    tk = _pick_chunk(k, max_tk)
    if tk is None:
        # Rare: no clean divisor of K under the budget -> pad K here (one extra HBM pass
        # over W for this layer; avoided whenever K chunks cleanly).
        tk = (max_tk // 128) * 128
        k_pad = _round_up(k, tk)
        x_pad = jnp.pad(x_pad, ((0, 0), (0, k_pad - k)))
        w = jnp.pad(w, ((0, k_pad - k), (0, 0)))
        k = k_pad

    return pl.pallas_call(
        _linear_ln_relu_kernel,
        out_shape=jax.ShapeDtypeStruct((m_pad, n), out_dtype),
        grid=(m_pad // tm, k // tk),                 # reduction axis (K) last
        in_specs=[
            pl.BlockSpec((tm, tk), lambda i, kk: (i, kk)),
            pl.BlockSpec((tk, n), lambda i, kk: (kk, 0)),
            _grid_invariant_spec((1, n), 2),          # bias
            _grid_invariant_spec((1, n), 2),          # gamma
            _grid_invariant_spec((1, n), 2),          # beta
        ],
        out_specs=pl.BlockSpec((tm, n), lambda i, kk: (i, 0)),
        scratch_shapes=[pltpu.VMEM((tm, n), jnp.float32)],
        compiler_params=pltpu.CompilerParams(
            dimension_semantics=("parallel", "arbitrary"),
            vmem_limit_bytes=int(vmem_limit)),
        cost_estimate=pl.CostEstimate(
            flops=int(2 * m_pad * k * n),
            transcendentals=int(m_pad),
            bytes_accessed=int(x_pad.size * x_pad.dtype.itemsize
                               + w.size * w.dtype.itemsize + m_pad * n * out_it)),
    )(x_pad, w, b, gamma, beta)


def _linear_max_tk(tn, tm, x_it, w_it, out_it, vmem_limit):
    reserved = tm * tn * 4 + 2 * tm * tn * out_it + 4 * 1024 * 1024
    avail = max(vmem_limit - reserved, 1)
    per_tk = 2 * (tm * x_it + tn * w_it)
    return int(min(max(avail // per_tk, 128), 1024))


def _linear_tiled(x_pad, w, b, *, tm, vmem_limit, out_dtype):
    """Final Linear (no LN): 3-D grid (M_tiles, N_tiles, K_tiles) with N tiled so wide
    output layers stream through VMEM; output last dim padded to 128 for lane-dense
    stores (extra columns sliced away by the caller)."""
    m_pad, k = x_pad.shape
    n = w.shape[1]
    n_pad = _round_up(n, 128)
    if n_pad != n:
        w = jnp.pad(w, ((0, 0), (0, n_pad - n)))
        b = jnp.pad(b, ((0, 0), (0, n_pad - n)))
    tn = _pick_chunk(n_pad, 512)
    out_it = jnp.dtype(out_dtype).itemsize
    max_tk = _linear_max_tk(tn, tm, x_pad.dtype.itemsize, w.dtype.itemsize, out_it,
                            vmem_limit)
    tk = _pick_chunk(k, max_tk)
    if tk is None:
        tk = (max_tk // 128) * 128
        k_pad = _round_up(k, tk)
        x_pad = jnp.pad(x_pad, ((0, 0), (0, k_pad - k)))
        w = jnp.pad(w, ((0, k_pad - k), (0, 0)))
        k = k_pad

    return pl.pallas_call(
        _linear_kernel,
        out_shape=jax.ShapeDtypeStruct((m_pad, n_pad), out_dtype),
        grid=(m_pad // tm, n_pad // tn, k // tk),   # reduction axis (K) last
        in_specs=[
            pl.BlockSpec((tm, tk), lambda i, j, kk: (i, kk)),
            pl.BlockSpec((tk, tn), lambda i, j, kk: (kk, j)),
            pl.BlockSpec((1, tn), lambda i, j, kk: (0, j)),
        ],
        out_specs=pl.BlockSpec((tm, tn), lambda i, j, kk: (i, j)),
        scratch_shapes=[pltpu.VMEM((tm, tn), jnp.float32)],
        compiler_params=pltpu.CompilerParams(
            dimension_semantics=("parallel", "parallel", "arbitrary"),
            vmem_limit_bytes=int(vmem_limit)),
        cost_estimate=pl.CostEstimate(
            flops=int(2 * m_pad * k * n_pad),
            transcendentals=0,
            bytes_accessed=int(x_pad.size * x_pad.dtype.itemsize
                               + w.size * w.dtype.itemsize + m_pad * n_pad * out_it)),
    )(x_pad, w, b)


def mlp_forward_layered(x, params, norms, *, tm, vmem_limit):
    """Per-layer kernels.  The batch is padded once and the padded activation is passed
    between layers (no per-layer slice + re-pad HBM round-trips); hidden activations
    travel in the matmul dtype (bf16) to halve inter-layer HBM traffic."""
    batch = x.shape[0]
    out_dim = params[-1]["w"].shape[1]
    m_pad = _round_up(max(batch, 1), tm)
    h = jnp.pad(x, ((0, m_pad - batch), (0, 0))) if m_pad != batch else x
    act_dtype = params[0]["w"].dtype
    for layer, norm in zip(params[:-1], norms):
        h = _ln_layer_tiled(h, layer["w"], layer["b"], norm["gamma"], norm["beta"],
                            tm=tm, vmem_limit=vmem_limit, out_dtype=act_dtype)
    last = params[-1]
    out = _linear_tiled(h, last["w"], last["b"], tm=tm, vmem_limit=vmem_limit,
                        out_dtype=x.dtype)
    return out[:batch, :out_dim]


# --------------------------------------------------------------------------------------
# Dispatch, init, reference
# --------------------------------------------------------------------------------------
def _fused_fits(x, params, norms, tm, vmem_limit):
    """Conservative VMEM estimate for the fused path: resident parameters (x1 when
    single-buffering is available, x2 otherwise), double-buffered I/O batch tiles,
    live f32 activations, plus headroom for Mosaic internal scratch."""
    out_dim = params[-1]["w"].shape[1]
    n_out = _round_up(out_dim, 128)
    widest = max([x.shape[1]] + [l["w"].shape[1] for l in params])
    buf = 1 if _single_buffer_supported() else 2
    resident = _resident_bytes(params, norms)
    resident += (n_out - out_dim) * (params[-1]["w"].shape[0]
                                     * params[-1]["w"].dtype.itemsize
                                     + params[-1]["b"].dtype.itemsize)
    io = 2 * tm * x.shape[1] * x.dtype.itemsize + 2 * tm * n_out * x.dtype.itemsize
    live = 2 * tm * widest * 4
    headroom = 2 * 1024 * 1024
    return buf * resident + io + live + headroom <= vmem_limit


def mlp_forward(x, params, norms):
    """Dispatch: one fully fused kernel when all parameters fit resident in VMEM and
    there are enough batch tiles to hide their one-time DMA; otherwise per-layer tiled
    kernels that stream the weights."""
    vmem_limit = _vmem_limit_bytes()
    sublane = 16 if jnp.dtype(params[0]["w"].dtype).itemsize == 2 else 8
    tm = _choose_tm(x.shape[0], sublane)
    m_tiles = _round_up(max(x.shape[0], 1), tm) // tm
    # With <2 batch tiles the up-front resident-weight DMA is not hidden behind compute
    # (and on v7x both TensorCores stall on it) -> stream weights layer-by-layer.
    prefer_layered = m_tiles < 2 and _resident_bytes(params, norms) > (2 << 20)
    if not prefer_layered and _fused_fits(x, params, norms, tm, vmem_limit):
        return mlp_forward_fused(x, params, norms, tm=tm, vmem_limit=vmem_limit)
    return mlp_forward_layered(x, params, norms, tm=tm, vmem_limit=vmem_limit)


def init_mlp_params(key, input_dim, output_dim, hidden_dims, weight_dtype=jnp.bfloat16):
    """Mimics the module's init: kaiming_normal_ weights (fan_in, relu gain),
    N(0, 1e-6) bias, LayerNorm affine = (ones, zeros).  Weights are stored in
    `weight_dtype` (bf16 by default: the MXU's native dtype); biases and LN params
    stay f32 since they only enter the f32 epilogue math."""
    if isinstance(hidden_dims, int):
        hidden_dims = [hidden_dims]
    dims = [input_dim] + list(hidden_dims) + [output_dim]
    params = []
    for in_dim, out_dim in zip(dims[:-1], dims[1:]):
        key, kw, kb = jax.random.split(key, 3)
        w = (jax.random.normal(kw, (in_dim, out_dim), jnp.float32)
             * jnp.sqrt(2.0 / in_dim)).astype(weight_dtype)
        b = jax.random.normal(kb, (1, out_dim), jnp.float32) * 1e-6
        params.append({"w": w, "b": b})
    norms = [
        {"gamma": jnp.ones((1, d), jnp.float32), "beta": jnp.zeros((1, d), jnp.float32)}
        for d in hidden_dims
    ]
    return params, norms


def mlp_forward_ref(x, params, norms):
    """Pure-JAX reference (f32 math; bf16 weights are up-cast before the matmul)."""
    for layer, norm in zip(params[:-1], norms):
        y = x @ layer["w"].astype(jnp.float32) + layer["b"]
        mean = jnp.mean(y, axis=-1, keepdims=True)
        var = jnp.mean((y - mean) ** 2, axis=-1, keepdims=True)
        y = (y - mean) / jnp.sqrt(var + LN_EPS)
        y = y * norm["gamma"] + norm["beta"]
        x = jnp.maximum(y, 0.0)
    last = params[-1]
    return x @ last["w"].astype(jnp.float32) + last["b"]


if __name__ == "__main__":
    key = jax.random.PRNGKey(0)
    batch, input_dim, output_dim = 2, 16, 8
    hidden_dims = [32, 32]

    kx, kp = jax.random.split(key)
    x = jax.random.normal(kx, (batch, input_dim), jnp.float32)

    # Resolve the cached hardware query / Buffered(1) probe eagerly, outside any trace.
    _vmem_limit_bytes()
    _single_buffer_supported()

    # bf16 weights (native MXU dtype) -- checked at bf16 tolerance.
    params, norms = init_mlp_params(kp, input_dim, output_dim, hidden_dims,
                                    weight_dtype=jnp.bfloat16)
    ref = mlp_forward_ref(x, params, norms)

    out = jax.jit(mlp_forward)(x, params, norms)
    jax.block_until_ready(out)
    assert out.shape == (batch, output_dim)
    assert jnp.allclose(out, ref, atol=6e-2, rtol=6e-2), "fused bf16 path mismatch vs reference"

    # f32 weights exercise the same kernels with f32 MXU passes (tighter tolerance;
    # default matmul precision may still use bf16 passes on either side, hence 1e-2).
    params32 = [{"w": p["w"].astype(jnp.float32), "b": p["b"]} for p in params]
    ref32 = mlp_forward_ref(x, params32, norms)
    out32 = jax.jit(mlp_forward)(x, params32, norms)
    jax.block_until_ready(out32)
    assert jnp.allclose(out32, ref32, atol=1e-2, rtol=1e-2), "fused f32 path mismatch vs reference"

    # Per-layer tiled fallback (the large-model path), exercised explicitly.
    out_layered = mlp_forward_layered(x, params, norms, tm=_choose_tm(batch, 16),
                                      vmem_limit=_vmem_limit_bytes())
    jax.block_until_ready(out_layered)
    assert out_layered.shape == (batch, output_dim)
    assert jnp.allclose(out_layered, ref, atol=6e-2, rtol=6e-2), "layered path mismatch vs reference"

    print("KERNEL_OK")
</pallas_src>

<mosaic_0001>
module attributes {stable_mosaic.version = 11 : i64} {
  func.func @_fused_mlp_kernel(%arg0: i32, %arg1: memref<16x16xf32, #tpu.memory_space<vmem>>, %arg2: memref<16x32xbf16, #tpu.memory_space<vmem>>, %arg3: memref<1x32xf32, #tpu.memory_space<vmem>>, %arg4: memref<1x32xf32, #tpu.memory_space<vmem>>, %arg5: memref<1x32xf32, #tpu.memory_space<vmem>>, %arg6: memref<32x32xbf16, #tpu.memory_space<vmem>>, %arg7: memref<1x32xf32, #tpu.memory_space<vmem>>, %arg8: memref<1x32xf32, #tpu.memory_space<vmem>>, %arg9: memref<1x32xf32, #tpu.memory_space<vmem>>, %arg10: memref<32x128xbf16, #tpu.memory_space<vmem>>, %arg11: memref<1x128xf32, #tpu.memory_space<vmem>>, %arg12: memref<16x128xf32, #tpu.memory_space<vmem>>) attributes {dimension_semantics = [#tpu.dimension_semantics<parallel>], iteration_bounds = array<i64: 1>, scalar_prefetch = 0 : i64, scratch_operands = 0 : i64, tpu.core_type = #tpu.core_type<tc>, window_params = [{transform_indices = @transform_0, window_bounds = array<i64: 16, 16>}, {pipeline_mode = #tpu.pipeline_mode<synchronous>, transform_indices = @transform_1, window_bounds = array<i64: 16, 32>}, {pipeline_mode = #tpu.pipeline_mode<synchronous>, transform_indices = @transform_2, window_bounds = array<i64: 1, 32>}, {pipeline_mode = #tpu.pipeline_mode<synchronous>, transform_indices = @transform_3, window_bounds = array<i64: 1, 32>}, {pipeline_mode = #tpu.pipeline_mode<synchronous>, transform_indices = @transform_4, window_bounds = array<i64: 1, 32>}, {pipeline_mode = #tpu.pipeline_mode<synchronous>, transform_indices = @transform_5, window_bounds = array<i64: 32, 32>}, {pipeline_mode = #tpu.pipeline_mode<synchronous>, transform_indices = @transform_6, window_bounds = array<i64: 1, 32>}, {pipeline_mode = #tpu.pipeline_mode<synchronous>, transform_indices = @transform_7, window_bounds = array<i64: 1, 32>}, {pipeline_mode = #tpu.pipeline_mode<synchronous>, transform_indices = @transform_8, window_bounds = array<i64: 1, 32>}, {pipeline_mode = #tpu.pipeline_mode<synchronous>, transform_indices = @transform_9, window_bounds = array<i64: 32, 128>}, {pipeline_mode = #tpu.pipeline_mode<synchronous>, transform_indices = @transform_10, window_bounds = array<i64: 1, 128>}, {transform_indices = @transform_11, window_bounds = array<i64: 16, 128>}]} {
    %c0 = arith.constant 0 : index
    %c0_0 = arith.constant 0 : index
    %0 = vector.load %arg1[%c0, %c0_0] : memref<16x16xf32, #tpu.memory_space<vmem>>, vector<16x16xf32>
    %1 = arith.truncf %0 : vector<16x16xf32> to vector<16x16xbf16>
    %c0_1 = arith.constant 0 : index
    %c0_2 = arith.constant 0 : index
    %2 = vector.load %arg2[%c0_1, %c0_2] : memref<16x32xbf16, #tpu.memory_space<vmem>>, vector<16x32xbf16>
    %cst = arith.constant dense<0.000000e+00> : vector<16x32xf32>
    %3 = tpu.matmul %1, %2, %cst {dimension_numbers = #tpu.dot_dimension_numbers<[1], [0], [0], [1], [0, 0, 1, 1], [], []>} : vector<16x16xbf16>, vector<16x32xbf16>, vector<16x32xf32> -> vector<16x32xf32>
    %c0_3 = arith.constant 0 : index
    %c0_4 = arith.constant 0 : index
    %4 = vector.load %arg3[%c0_3, %c0_4] : memref<1x32xf32, #tpu.memory_space<vmem>>, vector<1x32xf32>
    %5 = vector.broadcast %4 : vector<1x32xf32> to vector<16x32xf32>
    %6 = arith.addf %3, %5 : vector<16x32xf32>
    %c0_5 = arith.constant 0 : index
    %c0_6 = arith.constant 0 : index
    %7 = vector.load %arg4[%c0_5, %c0_6] : memref<1x32xf32, #tpu.memory_space<vmem>>, vector<1x32xf32>
    %c0_7 = arith.constant 0 : index
    %c0_8 = arith.constant 0 : index
    %8 = vector.load %arg5[%c0_7, %c0_8] : memref<1x32xf32, #tpu.memory_space<vmem>>, vector<1x32xf32>
    %cst_9 = arith.constant dense<0.000000e+00> : vector<16xf32>
    %9 = vector.multi_reduction <add>, %6, %cst_9 [1] : vector<16x32xf32> to vector<16xf32>
    %10 = vector.shape_cast %9 : vector<16xf32> to vector<16x1xf32>
    %cst_10 = arith.constant 3.125000e-02 : f32
    %11 = vector.broadcast %cst_10 : f32 to vector<16x1xf32>
    %12 = arith.mulf %10, %11 : vector<16x1xf32>
    %13 = vector.broadcast %12 : vector<16x1xf32> to vector<16x32xf32>
    %14 = arith.subf %6, %13 : vector<16x32xf32>
    %15 = arith.mulf %14, %14 : vector<16x32xf32>
    %cst_11 = arith.constant dense<0.000000e+00> : vector<16xf32>
    %16 = vector.multi_reduction <add>, %15, %cst_11 [1] : vector<16x32xf32> to vector<16xf32>
    %17 = vector.shape_cast %16 : vector<16xf32> to vector<16x1xf32>
    %cst_12 = arith.constant 3.125000e-02 : f32
    %18 = vector.broadcast %cst_12 : f32 to vector<16x1xf32>
    %19 = arith.mulf %17, %18 : vector<16x1xf32>
    %cst_13 = arith.constant 9.99999974E-6 : f32
    %20 = vector.broadcast %cst_13 : f32 to vector<16x1xf32>
    %21 = arith.addf %19, %20 : vector<16x1xf32>
    %22 = math.rsqrt %21 : vector<16x1xf32>
    %23 = vector.broadcast %22 : vector<16x1xf32> to vector<16x32xf32>
    %24 = arith.mulf %14, %23 : vector<16x32xf32>
    %25 = vector.broadcast %7 : vector<1x32xf32> to vector<16x32xf32>
    %26 = arith.mulf %24, %25 : vector<16x32xf32>
    %27 = vector.broadcast %8 : vector<1x32xf32> to vector<16x32xf32>
    %28 = arith.addf %26, %27 : vector<16x32xf32>
    %cst_14 = arith.constant 0.000000e+00 : f32
    %29 = vector.broadcast %cst_14 : f32 to vector<16x32xf32>
    %30 = arith.maximumf %28, %29 : vector<16x32xf32>
    %31 = arith.truncf %30 : vector<16x32xf32> to vector<16x32xbf16>
    %c0_15 = arith.constant 0 : index
    %c0_16 = arith.constant 0 : index
    %32 = vector.load %arg6[%c0_15, %c0_16] : memref<32x32xbf16, #tpu.memory_space<vmem>>, vector<32x32xbf16>
    %cst_17 = arith.constant dense<0.000000e+00> : vector<16x32xf32>
    %33 = tpu.matmul %31, %32, %cst_17 {dimension_numbers = #tpu.dot_dimension_numbers<[1], [0], [0], [1], [0, 0, 1, 1], [], []>} : vector<16x32xbf16>, vector<32x32xbf16>, vector<16x32xf32> -> vector<16x32xf32>
    %c0_18 = arith.constant 0 : index
    %c0_19 = arith.constant 0 : index
    %34 = vector.load %arg7[%c0_18, %c0_19] : memref<1x32xf32, #tpu.memory_space<vmem>>, vector<1x32xf32>
    %35 = vector.broadcast %34 : vector<1x32xf32> to vector<16x32xf32>
    %36 = arith.addf %33, %35 : vector<16x32xf32>
    %c0_20 = arith.constant 0 : index
    %c0_21 = arith.constant 0 : index
    %37 = vector.load %arg8[%c0_20, %c0_21] : memref<1x32xf32, #tpu.memory_space<vmem>>, vector<1x32xf32>
    %c0_22 = arith.constant 0 : index
    %c0_23 = arith.constant 0 : index
    %38 = vector.load %arg9[%c0_22, %c0_23] : memref<1x32xf32, #tpu.memory_space<vmem>>, vector<1x32xf32>
    %cst_24 = arith.constant dense<0.000000e+00> : vector<16xf32>
    %39 = vector.multi_reduction <add>, %36, %cst_24 [1] : vector<16x32xf32> to vector<16xf32>
    %40 = vector.shape_cast %39 : vector<16xf32> to vector<16x1xf32>
    %cst_25 = arith.constant 3.125000e-02 : f32
    %41 = vector.broadcast %cst_25 : f32 to vector<16x1xf32>
    %42 = arith.mulf %40, %41 : vector<16x1xf32>
    %43 = vector.broadcast %42 : vector<16x1xf32> to vector<16x32xf32>
    %44 = arith.subf %36, %43 : vector<16x32xf32>
    %45 = arith.mulf %44, %44 : vector<16x32xf32>
    %cst_26 = arith.constant dense<0.000000e+00> : vector<16xf32>
    %46 = vector.multi_reduction <add>, %45, %cst_26 [1] : vector<16x32xf32> to vector<16xf32>
    %47 = vector.shape_cast %46 : vector<16xf32> to vector<16x1xf32>
    %cst_27 = arith.constant 3.125000e-02 : f32
    %48 = vector.broadcast %cst_27 : f32 to vector<16x1xf32>
    %49 = arith.mulf %47, %48 : vector<16x1xf32>
    %cst_28 = arith.constant 9.99999974E-6 : f32
    %50 = vector.broadcast %cst_28 : f32 to vector<16x1xf32>
    %51 = arith.addf %49, %50 : vector<16x1xf32>
    %52 = math.rsqrt %51 : vector<16x1xf32>
    %53 = vector.broadcast %52 : vector<16x1xf32> to vector<16x32xf32>
    %54 = arith.mulf %44, %53 : vector<16x32xf32>
    %55 = vector.broadcast %37 : vector<1x32xf32> to vector<16x32xf32>
    %56 = arith.mulf %54, %55 : vector<16x32xf32>
    %57 = vector.broadcast %38 : vector<1x32xf32> to vector<16x32xf32>
    %58 = arith.addf %56, %57 : vector<16x32xf32>
    %cst_29 = arith.constant 0.000000e+00 : f32
    %59 = vector.broadcast %cst_29 : f32 to vector<16x32xf32>
    %60 = arith.maximumf %58, %59 : vector<16x32xf32>
    %61 = arith.truncf %60 : vector<16x32xf32> to vector<16x32xbf16>
    %c0_30 = arith.constant 0 : index
    %c0_31 = arith.constant 0 : index
    %62 = vector.load %arg10[%c0_30, %c0_31] : memref<32x128xbf16, #tpu.memory_space<vmem>>, vector<32x128xbf16>
    %cst_32 = arith.constant dense<0.000000e+00> : vector<16x128xf32>
    %63 = tpu.matmul %61, %62, %cst_32 {dimension_numbers = #tpu.dot_dimension_numbers<[1], [0], [0], [1], [0, 0, 1, 1], [], []>} : vector<16x32xbf16>, vector<32x128xbf16>, vector<16x128xf32> -> vector<16x128xf32>
    %c0_33 = arith.constant 0 : index
    %c0_34 = arith.constant 0 : index
    %64 = vector.load %arg11[%c0_33, %c0_34] : memref<1x128xf32, #tpu.memory_space<vmem>>, vector<1x128xf32>
    %65 = vector.broadcast %64 : vector<1x128xf32> to vector<16x128xf32>
    %66 = arith.addf %63, %65 : vector<16x128xf32>
    %c0_35 = arith.constant 0 : index
    %c0_36 = arith.constant 0 : index
    %67 = vector.load %arg12[%c0_35, %c0_36] : memref<16x128xf32, #tpu.memory_space<vmem>>, vector<16x128xf32>
    tpu.vector_store %arg12[%c0_35, %c0_36], %66 {strides = array<i32>} : memref<16x128xf32, #tpu.memory_space<vmem>>, vector<16x128xf32>,
    return
  }
  func.func @transform_0(%arg0: i32) -> (i32, i32) {
    %c0_i32 = arith.constant 0 : i32
    %c0_i32_0 = arith.constant 0 : i32
    return %arg0, %c0_i32 : i32, i32
  }
  func.func @transform_1(%arg0: i32) -> (i32, i32) {
    %c0_i32 = arith.constant 0 : i32
    %c0_i32_0 = arith.constant 0 : i32
    %c0_i32_1 = arith.constant 0 : i32
    return %c0_i32, %c0_i32_0 : i32, i32
  }
  func.func @transform_2(%arg0: i32) -> (i32, i32) {
    %c0_i32 = arith.constant 0 : i32
    %c0_i32_0 = arith.constant 0 : i32
    %c0_i32_1 = arith.constant 0 : i32
    return %c0_i32, %c0_i32_0 : i32, i32
  }
  func.func @transform_3(%arg0: i32) -> (i32, i32) {
    %c0_i32 = arith.constant 0 : i32
    %c0_i32_0 = arith.constant 0 : i32
    %c0_i32_1 = arith.constant 0 : i32
    return %c0_i32, %c0_i32_0 : i32, i32
  }
  func.func @transform_4(%arg0: i32) -> (i32, i32) {
    %c0_i32 = arith.constant 0 : i32
    %c0_i32_0 = arith.constant 0 : i32
    %c0_i32_1 = arith.constant 0 : i32
    return %c0_i32, %c0_i32_0 : i32, i32
  }
  func.func @transform_5(%arg0: i32) -> (i32, i32) {
    %c0_i32 = arith.constant 0 : i32
    %c0_i32_0 = arith.constant 0 : i32
    %c0_i32_1 = arith.constant 0 : i32
    return %c0_i32, %c0_i32_0 : i32, i32
  }
  func.func @transform_6(%arg0: i32) -> (i32, i32) {
    %c0_i32 = arith.constant 0 : i32
    %c0_i32_0 = arith.constant 0 : i32
    %c0_i32_1 = arith.constant 0 : i32
    return %c0_i32, %c0_i32_0 : i32, i32
  }
  func.func @transform_7(%arg0: i32) -> (i32, i32) {
    %c0_i32 = arith.constant 0 : i32
    %c0_i32_0 = arith.constant 0 : i32
    %c0_i32_1 = arith.constant 0 : i32
    return %c0_i32, %c0_i32_0 : i32, i32
  }
  func.func @transform_8(%arg0: i32) -> (i32, i32) {
    %c0_i32 = arith.constant 0 : i32
    %c0_i32_0 = arith.constant 0 : i32
    %c0_i32_1 = arith.constant 0 : i32
    return %c0_i32, %c0_i32_0 : i32, i32
  }
  func.func @transform_9(%arg0: i32) -> (i32, i32) {
    %c0_i32 = arith.constant 0 : i32
    %c0_i32_0 = arith.constant 0 : i32
    %c0_i32_1 = arith.constant 0 : i32
    return %c0_i32, %c0_i32_0 : i32, i32
  }
  func.func @transform_10(%arg0: i32) -> (i32, i32) {
    %c0_i32 = arith.constant 0 : i32
    %c0_i32_0 = arith.constant 0 : i32
    %c0_i32_1 = arith.constant 0 : i32
    return %c0_i32, %c0_i32_0 : i32, i32
  }
  func.func @transform_11(%arg0: i32) -> (i32, i32) {
    %c0_i32 = arith.constant 0 : i32
    %c0_i32_0 = arith.constant 0 : i32
    return %arg0, %c0_i32 : i32, i32
  }
}

</mosaic_0001>

<bundles_post_ra>
// kernel: mlp_forward.1
= control target key start
LH: loop header
LB: loop body
LE: loop exit
PB: predicated region body
PF: predicated region fallthrough
CT: control target
= control target key end

     0   :  { %v397_v0 = vmov 0.0   ;;  %vm398_vm0 = vmmov 0   ;;  %vm57_vm1 = vcmask 130048   ;;  %vm104_vm2 = vcmask 261120   ;;  %s525_s1 = inlined_call_operand.vmem [shape: bf16[16,32], index: 1, kind: input, shape index: {}]   ;;  %s526_s0 = inlined_call_operand.vmem [shape: f32[16,16], index: 0, kind: input, shape index: {}]   ;;  %s527_s2 = inlined_call_operand.vmem [shape: f32[1,32], index: 2, kind: input, shape index: {}]   ;;  %s528_s5 = inlined_call_operand.vmem [shape: bf16[32,32], index: 5, kind: input, shape index: {}]   ;;  %s529_s3 = inlined_call_operand.vmem [shape: f32[1,32], index: 3, kind: input, shape index: {}]   ;;  %s530_s4 = inlined_call_operand.vmem [shape: f32[1,32], index: 4, kind: input, shape index: {}]   ;;  %s531_s6 = inlined_call_operand.vmem [shape: f32[1,32], index: 6, kind: input, shape index: {}]   ;;  %s532_s9 = inlined_call_operand.vmem [shape: bf16[32,128], index: 9, kind: input, shape index: {}]   ;;  %s533_s7 = inlined_call_operand.vmem [shape: f32[1,32], index: 7, kind: input, shape index: {}]   ;;  %s534_s8 = inlined_call_operand.vmem [shape: f32[1,32], index: 8, kind: input, shape index: {}]   ;;  %s535_s10 = inlined_call_operand.vmem [shape: f32[1,128], index: 10, kind: input, shape index: {}]   ;;  %s536_s11 = inlined_call_operand.vmem [shape: f32[16,128], index: 11, kind: output, shape index: {}]  }
   0x1   :  { %360 = vmatprep.subr.bf16.mxu0 %v397_v0  ;;  %v384_v1 = vld [vmem:[%s525_s1] sm:$0xff]   ;;  %362 = vmatprep.mubr.msk.bf16.mxu0 %vm398_vm0, %v397_v0  ;;  %v40_v3 = vld [vmem:[%s526_s0 + $0x8] sm:$0xff] }
   0x2   :  { %v39_v2 = vld [vmem:[%s526_s0] sm:$0xff]  ;;  %366 = vmatprep.subr.bf16.mxu1 %v397_v0  ;;  %370 = vmatprep.mubr.msk.bf16.mxu1 %vm398_vm0, %v397_v0  ;;  %v385_v24 = vld [vmem:[%s528_s5 + $0x8] sm:$0xff]  }
   0x3   :  { %361 = vmatpush3.bf16.msra.mxu0 %v384_v1  ;;  %v41_v4 = vpack.c.bf16 %v40_v3, %v39_v2  ;;  %v337_v5 = vld [vmem:[%s527_s2] ss:$0 sm:$0xff]  ;;  %367 = vmatpush3.bf16.msra.mxu1 %v385_v24  ;;  %v387_v1 = vld [vmem:[%s532_s9 + $0x8] sm:$0xff]  }
   0x4   :  { %374 = vmatprep.subr.bf16.mxu0 %v397_v0  ;;  %v386_v25 = vld [vmem:[%s528_s5] sm:$0xff]   ;;  %368 = vmatprep.subr.bf16.mxu1 %v397_v0 }
   0x5   :  { %v340_v33 = vld [vmem:[%s529_s3] ss:$0 sm:$0xff] }
   0x6   :  { %363 = vmatmul.mubr.msk.bf16.vlgmr.msra.gmra.mxu0 %vm57_vm1, %v41_v4  ;;  %v341_v37 = vld [vmem:[%s530_s4] ss:$0 sm:$0xff] }
   0x7   :  { %378 = vmatprep.mubr.msk.bf16.mxu0 %vm398_vm0, %v397_v0  ;;  %369 = vmatpush3.bf16.msra.mxu1 %v386_v25  ;;  %v342_v45 = vld [vmem:[%s531_s6] ss:$0 sm:$0xff] }
   0x8   :  { %375 = vmatpush3.bf16.msra.mxu0 %v387_v1  ;;  %v388_v2 = vld [vmem:[%s532_s9] sm:$0xff]  }
   0x9   :  { %376 = vmatprep.subr.bf16.mxu0 %v397_v0  ;;  %v347_v0 = vld [vmem:[%s534_s8] ss:$0 sm:$0xff] }
   0xc   :  { %377 = vmatpush3.bf16.msra.mxu0 %v388_v2 }
  0xc6   :  { %v95_v6 = vpop.f32.mrf.mxu0 }
  0xc7   :  { %v96_v7 = vadd.f32 %v337_v5, %v95_v6 }
  0xc8   :  { %v364_v8 = vpop.f32.mrf.mxu0 }
  0xc9   :  { %v105_v9 = vsel %vm104_vm2, %v96_v7, 0.0 }
  0xca   :  { %106 = vadd.xlane.f32.xlu0 %v105_v9  ;;  %v98_v10 = vpop.f32.mrf.mxu0 }
  0xcb   :  { %v99_v11 = vadd.f32 %v337_v5, %v98_v10  ;;  %v346_v10 = vld [vmem:[%s533_s7] ss:$0 sm:$0xff] }
  0xcc   :  { %v365_v12 = vpop.f32.mrf.mxu0 }
  0xcd   :  { %v108_v13 = vsel %vm104_vm2, %v99_v11, 0.0 }
  0xce   :  { %109 = vadd.xlane.f32.xlu0 %v108_v13 }
 0x153   :  { %v107_v14 = vpop.xlane.xlu0 %106 }
 0x154   :  { %v111_v15 = vmul.f32 0.03125, %v107_v14 }
 0x156   :  { %v113_v16 = vsub.f32 %v96_v7, %v111_v15 }
 0x157   :  { %v110_v17 = vpop.xlane.xlu0 %109 }
 0x158   :  { %v112_v18 = vmul.f32 0.03125, %v110_v17  ;;  %v115_v19 = vmul.f32 %v113_v16, %v113_v16 }
 0x15a   :  { %v114_v20 = vsub.f32 %v99_v11, %v112_v18  ;;  %v117_v21 = vsel %vm104_vm2, %v115_v19, 0.0 }
 0x15b   :  { %118 = vadd.xlane.f32.xlu1 %v117_v21  ;;  %v348_v21 = vld [vmem:[%s535_s10] ss:$0 sm:$0xff] }
 0x15c   :  { %v116_v22 = vmul.f32 %v114_v20, %v114_v20 }
 0x15e   :  { %v120_v23 = vsel %vm104_vm2, %v116_v22, 0.0 }
 0x15f   :  { %121 = vadd.xlane.f32.xlu1 %v120_v23 }
 0x1e4   :  { %v119_v26 = vpop.xlane.xlu1 %118 }
 0x1e5   :  { %v123_v27 = vmul.f32 0.03125, %v119_v26 }
 0x1e7   :  { %v125_v28 = vadd.f32 1e-05, %v123_v27 }
 0x1e8   :  { %v122_v29 = vpop.xlane.xlu1 %121 }
 0x1e9   :  { %389 = vrsqrt.f32 %v125_v28  ;;  %v124_v30 = vmul.f32 0.03125, %v122_v29 }
 0x1eb   :  { %v126_v31 = vadd.f32 1e-05, %v124_v30 }
 0x1ed   :  { %391 = vrsqrt.f32 %v126_v31 }
 0x1f6   :  { %v390_v32 = vpop.eup %389 }
 0x1f7   :  { %v129_v34 = vmul.f32 %v390_v32, %v113_v16 }
 0x1f9   :  { %v137_v35 = vmul.f32 %v340_v33, %v129_v34 }
 0x1fa   :  { %v392_v36 = vpop.eup %391 }
 0x1fb   :  { %v130_v38 = vmul.f32 %v392_v36, %v114_v20  ;;  %v145_v40 = vadd.f32 %v341_v37, %v137_v35 }
 0x1fd   :  { %v138_v39 = vmul.f32 %v340_v33, %v130_v38  ;;  %v147_v42 = vmax.f32 %v145_v40, 0.0 }
 0x1ff   :  { %v146_v41 = vadd.f32 %v341_v37, %v138_v39 }
 0x201   :  { %v148_v43 = vmax.f32 %v146_v41, 0.0 }
 0x203   :  { %v149_v44 = vpack.c.bf16 %v148_v43, %v147_v42 }
 0x205   :  { %371 = vmatmul.mubr.msk.bf16.vlgmr.msra.gmra.mxu1 %vm104_vm2, %v149_v44 }
 0x2c5   :  { %v210_v46 = vpop.f32.mrf.mxu1 }
 0x2c6   :  { %v211_v47 = vadd.f32 %v342_v45, %v210_v46 }
 0x2c7   :  { %v372_v48 = vpop.f32.mrf.mxu1 }
 0x2c8   :  { %v219_v49 = vsel %vm104_vm2, %v211_v47, 0.0 }
 0x2c9   :  { %220 = vadd.xlane.f32.xlu0 %v219_v49  ;;  %v213_v50 = vpop.f32.mrf.mxu1 }
 0x2ca   :  { %v214_v51 = vadd.f32 %v342_v45, %v213_v50 }
 0x2cb   :  { %v373_v52 = vpop.f32.mrf.mxu1 }
 0x2cc   :  { %v222_v53 = vsel %vm104_vm2, %v214_v51, 0.0 }
 0x2cd   :  { %223 = vadd.xlane.f32.xlu1 %v222_v53 }
 0x352   :  { %v221_v54 = vpop.xlane.xlu0 %220 }
 0x353   :  { %v225_v55 = vmul.f32 0.03125, %v221_v54 }
 0x355   :  { %v227_v56 = vsub.f32 %v211_v47, %v225_v55 }
 0x356   :  { %v224_v57 = vpop.xlane.xlu1 %223 }
 0x357   :  { %v226_v58 = vmul.f32 0.03125, %v224_v57  ;;  %v229_v59 = vmul.f32 %v227_v56, %v227_v56 }
 0x359   :  { %v228_v60 = vsub.f32 %v214_v51, %v226_v58  ;;  %v231_v61 = vsel %vm104_vm2, %v229_v59, 0.0 }
 0x35a   :  { %232 = vadd.xlane.f32.xlu0 %v231_v61 }
 0x35b   :  { %v230_v62 = vmul.f32 %v228_v60, %v228_v60 }
 0x35d   :  { %v234_v63 = vsel %vm104_vm2, %v230_v62, 0.0 }
 0x35e   :  { %235 = vadd.xlane.f32.xlu1 %v234_v63 }
 0x3e3   :  { %v233_v3 = vpop.xlane.xlu0 %232 }
 0x3e4   :  { %v237_v4 = vmul.f32 0.03125, %v233_v3 }
 0x3e6   :  { %v239_v5 = vadd.f32 1e-05, %v237_v4 }
 0x3e7   :  { %v236_v6 = vpop.xlane.xlu1 %235 }
 0x3e8   :  { %393 = vrsqrt.f32 %v239_v5  ;;  %v238_v7 = vmul.f32 0.03125, %v236_v6 }
 0x3ea   :  { %v240_v8 = vadd.f32 1e-05, %v238_v7 }
 0x3ec   :  { %395 = vrsqrt.f32 %v240_v8 }
 0x3f5   :  { %v394_v9 = vpop.eup %393 }
 0x3f6   :  { %v243_v11 = vmul.f32 %v394_v9, %v227_v56 }
 0x3f8   :  { %v251_v12 = vmul.f32 %v346_v10, %v243_v11 }
 0x3f9   :  { %v396_v13 = vpop.eup %395 }
 0x3fa   :  { %v244_v14 = vmul.f32 %v396_v13, %v228_v60  ;;  %v259_v16 = vadd.f32 %v347_v0, %v251_v12 }
 0x3fc   :  { %v252_v15 = vmul.f32 %v346_v10, %v244_v14  ;;  %v261_v18 = vmax.f32 %v259_v16, 0.0 }
 0x3fe   :  { %v260_v17 = vadd.f32 %v347_v0, %v252_v15 }
 0x400   :  { %v262_v19 = vmax.f32 %v260_v17, 0.0 }
 0x402   :  { %v263_v20 = vpack.c.bf16 %v262_v19, %v261_v18 }
 0x404   :  { %379 = vmatmul.mubr.msk.bf16.vlgmr.msra.gmra.mxu0 %vm104_vm2, %v263_v20 }
 0x4c4   :  { %v324_v22 = vpop.f32.mrf.mxu0 }
 0x4c5   :  { %v325_v23 = vadd.f32 %v348_v21, %v324_v22 }
 0x4c6   :  { %v380_v24 = vpop.f32.mrf.mxu0 }
 0x4c7   :  { %331 = vst [vmem:[%s536_s11] sm:$0xff] %v325_v23 }
 0x4c8   :  { %v327_v25 = vpop.f32.mrf.mxu0 }
 0x4c9   :  { %v328_v26 = vadd.f32 %v348_v21, %v327_v25 }
 0x4ca   :  { %v381_v27 = vpop.f32.mrf.mxu0 }
 0x4cb   :  { %332 = vst [vmem:[%s536_s11 + $0x8] sm:$0xff] %v328_v26 }

</bundles_post_ra>
